<compile_context>
chip_gen: v5e
topology: v5e:2x2
jax: 0.10.0
libtpu: 0.0.40
codegen_flags: <defaults>
</compile_context>

<pallas_src>
import jax
import jax.numpy as jnp
from jax import lax
from jax.experimental import pallas as pl
from jax.experimental.pallas import tpu as pltpu


def _make_kernel(w_img, block_b):
    """Kernel closure; w_img (image width) fixes the 3x3 tap lane shifts."""

    def kernel(x_ref, mask_ref, w2_ref, b2_ref, w3_ref, b3_ref, o_ref):
        # x_ref   : (block_b, Cp,  HW) f32   activations, spatial on lanes
        # mask_ref: (9, 1, HW)         f32   per-tap edge-validity masks
        # w2_ref  : (Cmid, 9*Cp)       bf16  conv1+BN1 fused into conv2+BN2
        # b2_ref  : (Cmid, HW)         f32   padding-aware spatial bias map
        # w3_ref  : (Cout, Cmid)       bf16  conv3 + BN3 + residual doubling
        # b3_ref  : (Cout, 1)          f32
        # o_ref   : (block_b, Cout, HW) f32
        hw = x_ref.shape[2]

        def one_image(i, carry):
            x = x_ref[i]                                    # (Cp, HW) f32
            # im2col kept in vregs: 9 lane rotations of x, edge-masked.
            # f32 roll/mask path (v5e-safe); one bf16 cast on the whole matrix.
            parts = []
            for ky in range(3):
                for kx in range(3):
                    s = (ky - 1) * w_img + (kx - 1)         # flat-HW tap offset
                    rolled = pltpu.roll(x, (-s) % hw, axis=1) if s else x
                    tap = ky * 3 + kx
                    parts.append(jnp.where(mask_ref[tap] > 0.0, rolled, 0.0))
            col = jnp.concatenate(parts, axis=0).astype(jnp.bfloat16)  # (9*Cp, HW)

            # fused conv1+conv2 (+BN1+BN2): one MXU matmul, f32 accumulation.
            h2 = jnp.dot(w2_ref[...], col,
                         preferred_element_type=jnp.float32) + b2_ref[...]
            # conv3 (1x1) + BN3; residual doubling folded into w3/b3.
            h3 = jnp.dot(w3_ref[...], h2.astype(jnp.bfloat16),
                         preferred_element_type=jnp.float32) + b3_ref[...]
            o_ref[i] = jnp.maximum(h3, 0.0)
            return carry

        if block_b == 1:
            one_image(0, 0)
        else:
            lax.fori_loop(0, block_b, one_image, 0, unroll=True)

    return kernel


def _tap_masks(h_img, w_img):
    """(9, H*W) f32 validity masks for the 9 taps of a 3x3 'SAME' conv."""
    hw = jnp.arange(h_img * w_img, dtype=jnp.int32)
    y = hw // w_img
    x = hw % w_img
    masks = []
    for ky in range(3):
        for kx in range(3):
            dy, dx = ky - 1, kx - 1
            ok = ((y + dy >= 0) & (y + dy < h_img) &
                  (x + dx >= 0) & (x + dx < w_img))
            masks.append(ok.astype(jnp.float32))
    return jnp.stack(masks)                                  # (9, HW)


def _fold_params(p, masks2d, cin_p):
    """Fuse conv1+BN1 into conv2+BN2; fold BN3 and the 2x residual doubling.

    Returns bf16 matmul weights + f32 biases:
      w2f (Cmid, 9*cin_p), b2map (Cmid, HW), w3f (Cout, Cmid), b3f (Cout, 1)
    """
    cin, _ = p['w1'].shape
    a1 = p['s1'][:, None] * p['w1'].T                        # (Cmid, Cin) = S1@A1
    blocks, btaps = [], []
    for ky in range(3):
        for kx in range(3):
            a2 = p['s2'][:, None] * p['w2'][ky, kx].T        # (Cmid, Cmid) = S2@A2_tap
            blk = a2 @ a1                                    # (Cmid, Cin)
            if cin_p != cin:
                blk = jnp.pad(blk, ((0, 0), (0, cin_p - cin)))
            blocks.append(blk)
            btaps.append(a2 @ p['b1'])                       # (Cmid,)
    w2f = jnp.concatenate(blocks, axis=1).astype(jnp.bfloat16)      # (Cmid, 9*Cp)
    # spatial bias: b2 + conv1 bias flowing only through the valid (unpadded) taps
    b2map = p['b2'][:, None] + jnp.einsum('tc,tp->cp', jnp.stack(btaps), masks2d)
    b2map = b2map.astype(jnp.float32)                                # (Cmid, HW)
    w3f = (2.0 * p['s3'][:, None] * p['w3'].T).astype(jnp.bfloat16)  # (Cout, Cmid)
    b3f = (2.0 * p['b3'])[:, None].astype(jnp.float32)               # (Cout, 1)
    return w2f, b2map, w3f, b3f


def bottleneck_forward(x_nchw, p, *, block_b=None):
    B, Cin, H, W = x_nchw.shape
    HW = H * W
    cin_p = ((Cin + 7) // 8) * 8     # pad channels so each im2col tap chunk is
                                     # a full (8,128) f32 sublane tile
    masks2d = _tap_masks(H, W)                               # (9, HW)
    w2f, b2map, w3f, b3f = _fold_params(p, masks2d, cin_p)
    Cmid = w2f.shape[0]
    Cout = w3f.shape[0]
    masks = masks2d.reshape(9, 1, HW)

    if block_b is None:
        # keep the "parallel" grid axis >= 2 (v7x has two TensorCores) while
        # batching several images per step to amortize per-grid-step overhead.
        block_b = B // 2 if (B >= 2 and B % 2 == 0) else 1
    assert B % block_b == 0, (B, block_b)
    grid_b = B // block_b

    x = x_nchw.reshape(B, Cin, HW)   # free reshape: NCHW is contiguous
    if cin_p != Cin:
        x = jnp.pad(x, ((0, 0), (0, cin_p - Cin), (0, 0)))

    flops = 2 * B * HW * Cmid * (9 * cin_p + Cout)
    bytes_accessed = (4 * (B * cin_p * HW + B * Cout * HW + masks.size
                           + b2map.size + b3f.size)
                      + 2 * (w2f.size + w3f.size))

    out = pl.pallas_call(
        _make_kernel(W, block_b),
        out_shape=jax.ShapeDtypeStruct((B, Cout, HW), jnp.float32),
        grid=(grid_b,),
        in_specs=[
            pl.BlockSpec((block_b, cin_p, HW), lambda b: (b, 0, 0)),  # streams
            pl.BlockSpec((9, 1, HW), lambda b: (0, 0, 0)),            # resident
            pl.BlockSpec((Cmid, 9 * cin_p), lambda b: (0, 0)),        # resident
            pl.BlockSpec((Cmid, HW), lambda b: (0, 0)),
            pl.BlockSpec((Cout, Cmid), lambda b: (0, 0)),
            pl.BlockSpec((Cout, 1), lambda b: (0, 0)),
        ],
        out_specs=pl.BlockSpec((block_b, Cout, HW), lambda b: (b, 0, 0)),
        compiler_params=pltpu.CompilerParams(
            dimension_semantics=("parallel",)),
        cost_estimate=pl.CostEstimate(flops=int(flops), transcendentals=0,
                                      bytes_accessed=int(bytes_accessed)),
    )(x, masks, w2f, b2map, w3f, b3f)

    return out.reshape(B, Cout, H, W)   # free reshape back to NCHW


def make_params(key, cin, cout, base_width=64):
    # gamma = (base_width // 64) * out_channels; mid channels = gamma * out_channels
    gamma = (base_width // 64) * cout
    cmid = gamma * cout
    keys = jax.random.split(key, 16)
    eps = 1e-5

    def fold_bn(kg, kb, km, kv, c):
        g = 1.0 + 0.1 * jax.random.normal(kg, (c,), jnp.float32)
        beta = 0.1 * jax.random.normal(kb, (c,), jnp.float32)
        mean = 0.1 * jax.random.normal(km, (c,), jnp.float32)
        var = 1.0 + 0.1 * jax.random.uniform(kv, (c,), jnp.float32)
        scale = g / jnp.sqrt(var + eps)
        bias = beta - mean * scale
        return scale, bias

    # conv weights stored in (in, out) / HWIO form (PyTorch OIHW transposed)
    w1 = 0.2 * jax.random.normal(keys[0], (cin, cmid), jnp.float32)
    w2 = 0.2 * jax.random.normal(keys[1], (3, 3, cmid, cmid), jnp.float32)
    w3 = 0.2 * jax.random.normal(keys[2], (cmid, cout), jnp.float32)
    s1, b1 = fold_bn(keys[3], keys[4], keys[5], keys[6], cmid)
    s2, b2 = fold_bn(keys[7], keys[8], keys[9], keys[10], cmid)
    s3, b3 = fold_bn(keys[11], keys[12], keys[13], keys[14], cout)
    return dict(w1=w1, s1=s1, b1=b1, w2=w2, s2=s2, b2=b2, w3=w3, s3=s3, b3=b3)


def ref_forward(x_nchw, p):
    hp = lax.Precision.HIGHEST
    x = jnp.transpose(x_nchw, (0, 2, 3, 1))
    h = jnp.einsum('bhwc,cd->bhwd', x, p['w1'], precision=hp) * p['s1'] + p['b1']
    h = lax.conv_general_dilated(h, p['w2'], window_strides=(1, 1), padding='SAME',
                                 dimension_numbers=('NHWC', 'HWIO', 'NHWC'),
                                 precision=hp)
    h = h * p['s2'] + p['b2']
    h = jnp.einsum('bhwc,cd->bhwd', h, p['w3'], precision=hp) * p['s3'] + p['b3']
    out = jnp.maximum(2.0 * h, 0.0)     # downsample == Identity on layer(x)
    return jnp.transpose(out, (0, 3, 1, 2))


if __name__ == "__main__":
    key = jax.random.PRNGKey(0)
    kx, kp = jax.random.split(key)
    # stride=1, in_channels == out_channels -> downsample is nn.Identity
    B, Cin, H, W = 2, 4, 16, 16
    Cout = Cin
    x = jax.random.normal(kx, (B, Cin, H, W), jnp.float32)
    params = make_params(kp, Cin, Cout, base_width=64)

    fwd = jax.jit(bottleneck_forward)
    out = jax.block_until_ready(fwd(x, params))

    ref = ref_forward(x, params)
    assert out.shape == (B, Cout, H, W), out.shape
    err = float(jnp.max(jnp.abs(out - ref)))
    # Kernel uses bf16 MXU operands with composed (folded) weights and f32
    # accumulation; reference is full f32.
    assert jnp.allclose(out, ref, rtol=2e-2, atol=3e-2), err
    print("KERNEL_OK")
</pallas_src>

<mosaic_0001>
module attributes {stable_mosaic.version = 11 : i64} {
  func.func @kernel(%arg0: i32, %arg1: memref<1x8x256xf32, #tpu.memory_space<vmem>>, %arg2: memref<9x1x256xf32, #tpu.memory_space<vmem>>, %arg3: memref<16x72xbf16, #tpu.memory_space<vmem>>, %arg4: memref<16x256xf32, #tpu.memory_space<vmem>>, %arg5: memref<4x16xbf16, #tpu.memory_space<vmem>>, %arg6: memref<4x1xf32, #tpu.memory_space<vmem>>, %arg7: memref<1x4x256xf32, #tpu.memory_space<vmem>>) attributes {dimension_semantics = [#tpu.dimension_semantics<parallel>], iteration_bounds = array<i64: 2>, scalar_prefetch = 0 : i64, scratch_operands = 0 : i64, tpu.core_type = #tpu.core_type<tc>, window_params = [{transform_indices = @transform_0, window_bounds = array<i64: 1, 8, 256>}, {pipeline_mode = #tpu.pipeline_mode<synchronous>, transform_indices = @transform_1, window_bounds = array<i64: 9, 1, 256>}, {pipeline_mode = #tpu.pipeline_mode<synchronous>, transform_indices = @transform_2, window_bounds = array<i64: 16, 72>}, {pipeline_mode = #tpu.pipeline_mode<synchronous>, transform_indices = @transform_3, window_bounds = array<i64: 16, 256>}, {pipeline_mode = #tpu.pipeline_mode<synchronous>, transform_indices = @transform_4, window_bounds = array<i64: 4, 16>}, {pipeline_mode = #tpu.pipeline_mode<synchronous>, transform_indices = @transform_5, window_bounds = array<i64: 4, 1>}, {transform_indices = @transform_6, window_bounds = array<i64: 1, 4, 256>}]} {
    %c0 = arith.constant 0 : index
    %c0_0 = arith.constant 0 : index
    %c0_1 = arith.constant 0 : index
    %0 = vector.load %arg1[%c0, %c0_0, %c0_1] : memref<1x8x256xf32, #tpu.memory_space<vmem>>, vector<1x8x256xf32>
    %1 = vector.shape_cast %0 : vector<1x8x256xf32> to vector<8x256xf32>
    %c17_i32 = arith.constant 17 : i32
    %2 = tpu.dynamic_rotate %1 by %c17_i32 dim 1 : vector<8x256xf32>, i32 -> vector<8x256xf32>
    %c0_2 = arith.constant 0 : index
    %c0_3 = arith.constant 0 : index
    %c0_4 = arith.constant 0 : index
    %3 = vector.load %arg2[%c0_2, %c0_3, %c0_4] : memref<9x1x256xf32, #tpu.memory_space<vmem>>, vector<1x1x256xf32>
    %4 = vector.shape_cast %3 : vector<1x1x256xf32> to vector<1x256xf32>
    %cst = arith.constant 0.000000e+00 : f32
    %5 = vector.broadcast %cst : f32 to vector<1x256xf32>
    %6 = arith.cmpf ogt, %4, %5 : vector<1x256xf32>
    %cst_5 = arith.constant 0.000000e+00 : f32
    %7 = vector.shape_cast %6 : vector<1x256xi1> to vector<1x256xi1>
    %8 = vector.broadcast %7 : vector<1x256xi1> to vector<8x256xi1>
    %9 = vector.broadcast %cst_5 : f32 to vector<8x256xf32>
    %10 = arith.select %8, %2, %9 : vector<8x256xi1>, vector<8x256xf32>
    %c16_i32 = arith.constant 16 : i32
    %11 = tpu.dynamic_rotate %1 by %c16_i32 dim 1 : vector<8x256xf32>, i32 -> vector<8x256xf32>
    %c1 = arith.constant 1 : index
    %c0_6 = arith.constant 0 : index
    %c0_7 = arith.constant 0 : index
    %12 = vector.load %arg2[%c1, %c0_6, %c0_7] : memref<9x1x256xf32, #tpu.memory_space<vmem>>, vector<1x1x256xf32>
    %13 = vector.shape_cast %12 : vector<1x1x256xf32> to vector<1x256xf32>
    %cst_8 = arith.constant 0.000000e+00 : f32
    %14 = vector.broadcast %cst_8 : f32 to vector<1x256xf32>
    %15 = arith.cmpf ogt, %13, %14 : vector<1x256xf32>
    %cst_9 = arith.constant 0.000000e+00 : f32
    %16 = vector.shape_cast %15 : vector<1x256xi1> to vector<1x256xi1>
    %17 = vector.broadcast %16 : vector<1x256xi1> to vector<8x256xi1>
    %18 = vector.broadcast %cst_9 : f32 to vector<8x256xf32>
    %19 = arith.select %17, %11, %18 : vector<8x256xi1>, vector<8x256xf32>
    %c15_i32 = arith.constant 15 : i32
    %20 = tpu.dynamic_rotate %1 by %c15_i32 dim 1 : vector<8x256xf32>, i32 -> vector<8x256xf32>
    %c2 = arith.constant 2 : index
    %c0_10 = arith.constant 0 : index
    %c0_11 = arith.constant 0 : index
    %21 = vector.load %arg2[%c2, %c0_10, %c0_11] : memref<9x1x256xf32, #tpu.memory_space<vmem>>, vector<1x1x256xf32>
    %22 = vector.shape_cast %21 : vector<1x1x256xf32> to vector<1x256xf32>
    %cst_12 = arith.constant 0.000000e+00 : f32
    %23 = vector.broadcast %cst_12 : f32 to vector<1x256xf32>
    %24 = arith.cmpf ogt, %22, %23 : vector<1x256xf32>
    %cst_13 = arith.constant 0.000000e+00 : f32
    %25 = vector.shape_cast %24 : vector<1x256xi1> to vector<1x256xi1>
    %26 = vector.broadcast %25 : vector<1x256xi1> to vector<8x256xi1>
    %27 = vector.broadcast %cst_13 : f32 to vector<8x256xf32>
    %28 = arith.select %26, %20, %27 : vector<8x256xi1>, vector<8x256xf32>
    %c1_i32 = arith.constant 1 : i32
    %29 = tpu.dynamic_rotate %1 by %c1_i32 dim 1 : vector<8x256xf32>, i32 -> vector<8x256xf32>
    %c3 = arith.constant 3 : index
    %c0_14 = arith.constant 0 : index
    %c0_15 = arith.constant 0 : index
    %30 = vector.load %arg2[%c3, %c0_14, %c0_15] : memref<9x1x256xf32, #tpu.memory_space<vmem>>, vector<1x1x256xf32>
    %31 = vector.shape_cast %30 : vector<1x1x256xf32> to vector<1x256xf32>
    %cst_16 = arith.constant 0.000000e+00 : f32
    %32 = vector.broadcast %cst_16 : f32 to vector<1x256xf32>
    %33 = arith.cmpf ogt, %31, %32 : vector<1x256xf32>
    %cst_17 = arith.constant 0.000000e+00 : f32
    %34 = vector.shape_cast %33 : vector<1x256xi1> to vector<1x256xi1>
    %35 = vector.broadcast %34 : vector<1x256xi1> to vector<8x256xi1>
    %36 = vector.broadcast %cst_17 : f32 to vector<8x256xf32>
    %37 = arith.select %35, %29, %36 : vector<8x256xi1>, vector<8x256xf32>
    %c4 = arith.constant 4 : index
    %c0_18 = arith.constant 0 : index
    %c0_19 = arith.constant 0 : index
    %38 = vector.load %arg2[%c4, %c0_18, %c0_19] : memref<9x1x256xf32, #tpu.memory_space<vmem>>, vector<1x1x256xf32>
    %39 = vector.shape_cast %38 : vector<1x1x256xf32> to vector<1x256xf32>
    %cst_20 = arith.constant 0.000000e+00 : f32
    %40 = vector.broadcast %cst_20 : f32 to vector<1x256xf32>
    %41 = arith.cmpf ogt, %39, %40 : vector<1x256xf32>
    %cst_21 = arith.constant 0.000000e+00 : f32
    %42 = vector.shape_cast %41 : vector<1x256xi1> to vector<1x256xi1>
    %43 = vector.broadcast %42 : vector<1x256xi1> to vector<8x256xi1>
    %44 = vector.broadcast %cst_21 : f32 to vector<8x256xf32>
    %45 = arith.select %43, %1, %44 : vector<8x256xi1>, vector<8x256xf32>
    %c255_i32 = arith.constant 255 : i32
    %46 = tpu.dynamic_rotate %1 by %c255_i32 dim 1 : vector<8x256xf32>, i32 -> vector<8x256xf32>
    %c5 = arith.constant 5 : index
    %c0_22 = arith.constant 0 : index
    %c0_23 = arith.constant 0 : index
    %47 = vector.load %arg2[%c5, %c0_22, %c0_23] : memref<9x1x256xf32, #tpu.memory_space<vmem>>, vector<1x1x256xf32>
    %48 = vector.shape_cast %47 : vector<1x1x256xf32> to vector<1x256xf32>
    %cst_24 = arith.constant 0.000000e+00 : f32
    %49 = vector.broadcast %cst_24 : f32 to vector<1x256xf32>
    %50 = arith.cmpf ogt, %48, %49 : vector<1x256xf32>
    %cst_25 = arith.constant 0.000000e+00 : f32
    %51 = vector.shape_cast %50 : vector<1x256xi1> to vector<1x256xi1>
    %52 = vector.broadcast %51 : vector<1x256xi1> to vector<8x256xi1>
    %53 = vector.broadcast %cst_25 : f32 to vector<8x256xf32>
    %54 = arith.select %52, %46, %53 : vector<8x256xi1>, vector<8x256xf32>
    %c241_i32 = arith.constant 241 : i32
    %55 = tpu.dynamic_rotate %1 by %c241_i32 dim 1 : vector<8x256xf32>, i32 -> vector<8x256xf32>
    %c6 = arith.constant 6 : index
    %c0_26 = arith.constant 0 : index
    %c0_27 = arith.constant 0 : index
    %56 = vector.load %arg2[%c6, %c0_26, %c0_27] : memref<9x1x256xf32, #tpu.memory_space<vmem>>, vector<1x1x256xf32>
    %57 = vector.shape_cast %56 : vector<1x1x256xf32> to vector<1x256xf32>
    %cst_28 = arith.constant 0.000000e+00 : f32
    %58 = vector.broadcast %cst_28 : f32 to vector<1x256xf32>
    %59 = arith.cmpf ogt, %57, %58 : vector<1x256xf32>
    %cst_29 = arith.constant 0.000000e+00 : f32
    %60 = vector.shape_cast %59 : vector<1x256xi1> to vector<1x256xi1>
    %61 = vector.broadcast %60 : vector<1x256xi1> to vector<8x256xi1>
    %62 = vector.broadcast %cst_29 : f32 to vector<8x256xf32>
    %63 = arith.select %61, %55, %62 : vector<8x256xi1>, vector<8x256xf32>
    %c240_i32 = arith.constant 240 : i32
    %64 = tpu.dynamic_rotate %1 by %c240_i32 dim 1 : vector<8x256xf32>, i32 -> vector<8x256xf32>
    %c7 = arith.constant 7 : index
    %c0_30 = arith.constant 0 : index
    %c0_31 = arith.constant 0 : index
    %65 = vector.load %arg2[%c7, %c0_30, %c0_31] : memref<9x1x256xf32, #tpu.memory_space<vmem>>, vector<1x1x256xf32>
    %66 = vector.shape_cast %65 : vector<1x1x256xf32> to vector<1x256xf32>
    %cst_32 = arith.constant 0.000000e+00 : f32
    %67 = vector.broadcast %cst_32 : f32 to vector<1x256xf32>
    %68 = arith.cmpf ogt, %66, %67 : vector<1x256xf32>
    %cst_33 = arith.constant 0.000000e+00 : f32
    %69 = vector.shape_cast %68 : vector<1x256xi1> to vector<1x256xi1>
    %70 = vector.broadcast %69 : vector<1x256xi1> to vector<8x256xi1>
    %71 = vector.broadcast %cst_33 : f32 to vector<8x256xf32>
    %72 = arith.select %70, %64, %71 : vector<8x256xi1>, vector<8x256xf32>
    %c239_i32 = arith.constant 239 : i32
    %73 = tpu.dynamic_rotate %1 by %c239_i32 dim 1 : vector<8x256xf32>, i32 -> vector<8x256xf32>
    %c8 = arith.constant 8 : index
    %c0_34 = arith.constant 0 : index
    %c0_35 = arith.constant 0 : index
    %74 = vector.load %arg2[%c8, %c0_34, %c0_35] : memref<9x1x256xf32, #tpu.memory_space<vmem>>, vector<1x1x256xf32>
    %75 = vector.shape_cast %74 : vector<1x1x256xf32> to vector<1x256xf32>
    %cst_36 = arith.constant 0.000000e+00 : f32
    %76 = vector.broadcast %cst_36 : f32 to vector<1x256xf32>
    %77 = arith.cmpf ogt, %75, %76 : vector<1x256xf32>
    %cst_37 = arith.constant 0.000000e+00 : f32
    %78 = vector.shape_cast %77 : vector<1x256xi1> to vector<1x256xi1>
    %79 = vector.broadcast %78 : vector<1x256xi1> to vector<8x256xi1>
    %80 = vector.broadcast %cst_37 : f32 to vector<8x256xf32>
    %81 = arith.select %79, %73, %80 : vector<8x256xi1>, vector<8x256xf32>
    %82 = tpu.concatenate %10, %19, %28, %37, %45, %54, %63, %72, %81 in 0 : vector<8x256xf32>, vector<8x256xf32>, vector<8x256xf32>, vector<8x256xf32>, vector<8x256xf32>, vector<8x256xf32>, vector<8x256xf32>, vector<8x256xf32>, vector<8x256xf32> -> vector<72x256xf32>
    %83 = arith.truncf %82 : vector<72x256xf32> to vector<72x256xbf16>
    %c0_38 = arith.constant 0 : index
    %c0_39 = arith.constant 0 : index
    %84 = vector.load %arg3[%c0_38, %c0_39] : memref<16x72xbf16, #tpu.memory_space<vmem>>, vector<16x72xbf16>
    %cst_40 = arith.constant dense<0.000000e+00> : vector<16x256xf32>
    %85 = tpu.matmul %84, %83, %cst_40 {dimension_numbers = #tpu.dot_dimension_numbers<[1], [0], [0], [1], [0, 0, 1, 1], [], []>} : vector<16x72xbf16>, vector<72x256xbf16>, vector<16x256xf32> -> vector<16x256xf32>
    %c0_41 = arith.constant 0 : index
    %c0_42 = arith.constant 0 : index
    %86 = vector.load %arg4[%c0_41, %c0_42] : memref<16x256xf32, #tpu.memory_space<vmem>>, vector<16x256xf32>
    %87 = arith.addf %85, %86 : vector<16x256xf32>
    %c0_43 = arith.constant 0 : index
    %c0_44 = arith.constant 0 : index
    %88 = vector.load %arg5[%c0_43, %c0_44] : memref<4x16xbf16, #tpu.memory_space<vmem>>, vector<4x16xbf16>
    %89 = arith.truncf %87 : vector<16x256xf32> to vector<16x256xbf16>
    %cst_45 = arith.constant dense<0.000000e+00> : vector<4x256xf32>
    %90 = tpu.matmul %88, %89, %cst_45 {dimension_numbers = #tpu.dot_dimension_numbers<[1], [0], [0], [1], [0, 0, 1, 1], [], []>} : vector<4x16xbf16>, vector<16x256xbf16>, vector<4x256xf32> -> vector<4x256xf32>
    %c0_46 = arith.constant 0 : index
    %c0_47 = arith.constant 0 : index
    %91 = vector.load %arg6[%c0_46, %c0_47] : memref<4x1xf32, #tpu.memory_space<vmem>>, vector<4x1xf32>
    %92 = vector.broadcast %91 : vector<4x1xf32> to vector<4x256xf32>
    %93 = arith.addf %90, %92 : vector<4x256xf32>
    %cst_48 = arith.constant 0.000000e+00 : f32
    %94 = vector.broadcast %cst_48 : f32 to vector<4x256xf32>
    %95 = arith.maximumf %93, %94 : vector<4x256xf32>
    %c0_49 = arith.constant 0 : index
    %c0_50 = arith.constant 0 : index
    %c0_51 = arith.constant 0 : index
    %96 = vector.load %arg7[%c0_49, %c0_50, %c0_51] : memref<1x4x256xf32, #tpu.memory_space<vmem>>, vector<1x4x256xf32>
    %97 = vector.shape_cast %96 : vector<1x4x256xf32> to vector<4x256xf32>
    %98 = vector.shape_cast %95 : vector<4x256xf32> to vector<1x4x256xf32>
    tpu.vector_store %arg7[%c0_49, %c0_50, %c0_51], %98 {strides = array<i32>} : memref<1x4x256xf32, #tpu.memory_space<vmem>>, vector<1x4x256xf32>,
    return
  }
  func.func @transform_0(%arg0: i32) -> (i32, i32, i32) {
    %c0_i32 = arith.constant 0 : i32
    %c0_i32_0 = arith.constant 0 : i32
    %c0_i32_1 = arith.constant 0 : i32
    return %arg0, %c0_i32, %c0_i32_0 : i32, i32, i32
  }
  func.func @transform_1(%arg0: i32) -> (i32, i32, i32) {
    %c0_i32 = arith.constant 0 : i32
    %c0_i32_0 = arith.constant 0 : i32
    %c0_i32_1 = arith.constant 0 : i32
    %c0_i32_2 = arith.constant 0 : i32
    return %c0_i32, %c0_i32_0, %c0_i32_1 : i32, i32, i32
  }
  func.func @transform_2(%arg0: i32) -> (i32, i32) {
    %c0_i32 = arith.constant 0 : i32
    %c0_i32_0 = arith.constant 0 : i32
    %c0_i32_1 = arith.constant 0 : i32
    return %c0_i32, %c0_i32_0 : i32, i32
  }
  func.func @transform_3(%arg0: i32) -> (i32, i32) {
    %c0_i32 = arith.constant 0 : i32
    %c0_i32_0 = arith.constant 0 : i32
    %c0_i32_1 = arith.constant 0 : i32
    return %c0_i32, %c0_i32_0 : i32, i32
  }
  func.func @transform_4(%arg0: i32) -> (i32, i32) {
    %c0_i32 = arith.constant 0 : i32
    %c0_i32_0 = arith.constant 0 : i32
    %c0_i32_1 = arith.constant 0 : i32
    return %c0_i32, %c0_i32_0 : i32, i32
  }
  func.func @transform_5(%arg0: i32) -> (i32, i32) {
    %c0_i32 = arith.constant 0 : i32
    %c0_i32_0 = arith.constant 0 : i32
    %c0_i32_1 = arith.constant 0 : i32
    return %c0_i32, %c0_i32_0 : i32, i32
  }
  func.func @transform_6(%arg0: i32) -> (i32, i32, i32) {
    %c0_i32 = arith.constant 0 : i32
    %c0_i32_0 = arith.constant 0 : i32
    %c0_i32_1 = arith.constant 0 : i32
    return %arg0, %c0_i32, %c0_i32_0 : i32, i32, i32
  }
}

</mosaic_0001>

<bundles_post_ra>
// kernel: bottleneck_forward.1
= control target key start
LH: loop header
LB: loop body
LE: loop exit
PB: predicated region body
PF: predicated region fallthrough
CT: control target
= control target key end

     0   :  { %s729_s21 = smov 0   ;;  %s988_s0 = inlined_call_operand.vmem [shape: f32[2,8,256], index: 0, kind: input, shape index: {}]   ;;  %s989_s1 = inlined_call_operand.vmem [shape: f32[9,1,256], index: 1, kind: input, shape index: {}]   ;;  %s990_s2 = inlined_call_operand.vmem [shape: bf16[16,72], index: 2, kind: input, shape index: {}]   ;;  %s991_s3 = inlined_call_operand.vmem [shape: f32[16,256], index: 3, kind: input, shape index: {}]   ;;  %s992_s4 = inlined_call_operand.vmem [shape: bf16[4,16], index: 4, kind: input, shape index: {}]   ;;  %s993_s5 = inlined_call_operand.vmem [shape: f32[4,1], index: 5, kind: input, shape index: {}]   ;;  %s994_s6 = inlined_call_operand.vmem [shape: f32[2,4,256], index: 6, kind: output, shape index: {}]  }
   0x1 LB: > { %s564_s22 = sadd.s32 4294967295, %s683_s21   ;;  %p568_p0 = scmp.ge.s32.totalorder %s683_s21, 1  ;;  %s683_s21 = sphi %s729_s21, %s16_s21  }
   0x2   : > { %p212_p1 = scmp.lt.s32.totalorder %s683_s21, 3 }
   0x4   : > { %p213_p2 = pnand %p568_p0, %p212_p1 }
   0x5   : > { %p242_p3 = scmp.lt.s32.totalorder (!%p213_p2), %s564_s22, 1  ;;  %s685_s27 = smov (!%p213_p2), 111  }
   0x6   : > { %216 = sbr.rel (%p213_p2) target bundleno = 441 (0x1b9), region = 44  ;;  %s686_s28 = smov (!%p213_p2), 112  }
   0x7   : > { %s687_s29 = smov (!%p213_p2), 15   ;;  %s688_s30 = smov (!%p213_p2), 113  }
   0x8   : > { %s689_s7 = smov (!%p213_p2), 127   ;;  %s690_s8 = smov (!%p213_p2), 1  }
   0x9   : > { %s691_s9 = smov (!%p213_p2), 16   ;;  %s692_s10 = smov (!%p213_p2), 17  }
   0xb   : > { %s1030_s22 = smov (!%p242_p3, %s564_s22), 1  ;;  %v693_v3 = vmov 0   ;;  %v580_v4 = vld [vmem:[%s989_s1 + $0x10] sm:$0x3]  ;;  %v578_v5 = vld [vmem:[%s989_s1 + $0xc] sm:$0x3]  ;;  %v259_v7 = vlaneseq }
   0xc   : > { %s615_s23 = sshll.u32 %s1030_s22, 4  ;;  %675 = vset.pattern.permute.xlu2 %v693_v3  ;;  %676 = vset.pattern.permute.xlu0 %v693_v3  ;;  %v579_v6 = vld [vmem:[%s989_s1 + $0xe] sm:$0x3]  ;;  %vm394_vm0 = vcmp.gt.f32.partialorder %v580_v4, 0.0  ;;  %vm360_vm1 = vcmp.gt.f32.partialorder %v578_v5, 0.0  ;;  %vm427_vm7 = vcmask 1043456  }
   0xd   : > { %s246_s26 = scalar_lea.vmem %s988_s0, %s615_s23  ;;  %vm377_vm2 = vcmp.gt.f32.partialorder %v579_v6, 0.0  ;;  %v576_v8 = vld [vmem:[%s989_s1 + $0x8] sm:$0x3]  ;;  %v577_v9 = vld [vmem:[%s989_s1 + $0xa] sm:$0x3]  ;;  %v395_v10 = vsel %vm394_vm0, 1, %v693_v3 }
   0xe   : > { %v743_v0 = vld [vmem:[%s246_s26] sm:$0xff]  ;;  %v745_v1 = vld [vmem:[%s246_s26 + $0x8] sm:$0xff]  ;;  %v361_v11 = vsel %vm360_vm1, 1, %v693_v3  ;;  %v378_v12 = vsel %vm377_vm2, 1, %v693_v3  ;;  %vm326_vm3 = vcmp.gt.f32.partialorder %v576_v8, 0.0  ;;  %vm343_vm4 = vcmp.gt.f32.partialorder %v577_v9, 0.0 }
   0xf   : > { %v635_v2 = vpack.i.bf16 %v745_v1, %v743_v0  ;;  %v771_v14 = vand.u32 127, %v259_v7  ;;  %v396_v15 = vperm.slane %v395_v10, 0  ;;  %v397_v16 = vperm.slane %v395_v10, 1  ;;  %v574_v28 = vld [vmem:[%s989_s1 + $0x4] sm:$0x3]  ;;  %s616_s23 = sshll.u32 %s1030_s22, 3 }
  0x10   : > { %v362_v17 = vperm.slane %v361_v11, 0  ;;  %v379_v18 = vperm.slane %v378_v12, 0  ;;  %v363_v19 = vperm.slane %v361_v11, 1  ;;  %v380_v20 = vperm.slane %v378_v12, 1  ;;  %v575_v29 = vld [vmem:[%s989_s1 + $0x6] sm:$0x3]  ;;  %s251_s26 = scalar_lea.vmem %s994_s6, %s616_s23 }
  0x11   : > { %636 = vrot.lane.b32.xlu0 %v635_v2, %s685_s27  ;;  %646 = vrot.lane.b32.xlu1 %v635_v2, %s686_s28  ;;  %v774_v21 = vsel %vm326_vm3, 1, %v693_v3  ;;  %v777_v22 = vsel %vm343_vm4, 1, %v693_v3  ;;  %vm389_vm5 = vcmp.lt.s32.totalorder %v771_v14, 111  ;;  %vm780_vm6 = vcmp.eq.s32.totalorder %v396_v15, 1  ;;  %v264_v48 = vld [vmem:[%s989_s1] sm:$0x3] }
  0x12   : > { %656 = vrot.lane.b32.xlu2 %v635_v2, %s687_s29  ;;  %vm784_vm8 = vcmp.eq.s32.totalorder %v397_v16, 1  ;;  %vm788_vm9 = vcmp.eq.s32.totalorder %v362_v17, 1  ;;  %vm372_vm10 = vcmp.lt.s32.totalorder %v771_v14, 112  ;;  %v328_v26 = vperm.slane %v774_v21, 0  ;;  %v573_v49 = vld [vmem:[%s989_s1 + $0x2] sm:$0x3] }
  0x13   : > { %v345_v27 = vperm.slane %v777_v22, 0  ;;  %vm355_vm11 = vcmp.lt.s32.totalorder %v771_v14, 113  ;;  %vm802_vm12 = vcmp.eq.s32.totalorder %v379_v18, 1  ;;  %vm806_vm13 = vcmp.eq.s32.totalorder %v363_v19, 1 }
  0x14   : > { %vm810_vm14 = vcmp.eq.s32.totalorder %v380_v20, 1  ;;  %v329_v37 = vperm.slane %v774_v21, 1  ;;  %v346_v38 = vperm.slane %v777_v22, 1  ;;  %vm294_vm0 = vcmp.lt.s32.totalorder %v771_v14, 15 }
  0x15   : > { %vm299_vm1 = vcmp.gt.f32.partialorder %v574_v28, 0.0  ;;  %vm311_vm2 = vcmp.lt.s32.totalorder %v771_v14, 1  ;;  %vm316_vm3 = vcmp.gt.f32.partialorder %v575_v29, 0.0  ;;  %vm823_vm4 = vcmp.eq.s32.totalorder %v328_v26, 1 }
  0x16   : > { %vm827_vm15 = vcmp.eq.s32.totalorder %v345_v27, 1  ;;  %v300_v52 = vsel %vm299_vm1, 1, %v693_v3  ;;  %v317_v53 = vsel %vm316_vm3, 1, %v693_v3  ;;  %vm598_vm1 = vmpackc.low %vm810_vm14, %vm806_vm13  ;;  %vm1011_vm3 = vcmp.lt.s32.totalorder %v771_v14, 127 }
  0x17   : > { %v301_v62 = vperm.slane %v300_v52, 0  ;;  %v318_v63 = vperm.slane %v317_v53, 0  ;;  %v319_v4 = vperm.slane %v317_v53, 1  ;;  %v415_v53 = vld [vmem:[%s991_s3 + $0x8] sm:$0xff] }
  0x19   : > { %641 = vrot.lane.b32.xlu0 %v635_v2, %s688_s30  ;;  %651 = vrot.lane.b32.xlu1 %v635_v2, %s689_s7  ;;  %vm903_vm14 = vcmp.eq.s32.totalorder %v301_v62, 1 }
  0x1a   : > { %661 = vrot.lane.b32.xlu2 %v635_v2, %s690_s8 }
  0x21   : > { %671 = vrot.lane.b32.xlu1 %v635_v2, %s691_s9  ;;  %666 = vrot.lane.b32.xlu0 %v635_v2, %s692_s10  ;;  %v302_v2 = vperm.slane %v300_v52, 1  ;;  %v414_v52 = vld [vmem:[%s991_s3] sm:$0xff] }
  0x6c   : > { %v769_v13 = vpop.permute.xlu2 %656 }
  0x6d   : > { %v659_v44 = vunpack.i.h.bf16 %v769_v13  ;;  %v658_v45 = vunpack.i.l.bf16 %v769_v13 }
  0x6f   : > { %v296_v21 = vsel %vm294_vm0, %v659_v44, %v658_v45  ;;  %v295_v23 = vsel %vm294_vm0, %v658_v45, %v659_v44  ;;  %vm915_vm0 = vcmp.eq.s32.totalorder %v319_v4, 1 }
  0x74   : > { %v662_v39 = vpop.permute.xlu2 %661 }
  0x75   : > { %v664_v56 = vunpack.i.h.bf16 %v662_v39  ;;  %v663_v57 = vunpack.i.l.bf16 %v662_v39 }
  0x77   : > { %v313_v22 = vsel %vm311_vm2, %v664_v56, %v663_v57  ;;  %v312_v24 = vsel %vm311_vm2, %v663_v57, %v664_v56  ;;  %vm261_vm2 = vcmp.lt.s32.totalorder %v771_v14, 17 }
  0x78   : > { %v592_v45 = vpack.c.bf16 %v313_v22, %v296_v21 }
  0x83   : > { %v637_v30 = vpop.permute.xlu0 %636  ;;  %v647_v31 = vpop.permute.xlu1 %646 }
  0x84   : > { %v639_v35 = vunpack.i.h.bf16 %v637_v30  ;;  %v638_v36 = vunpack.i.l.bf16 %v637_v30  ;;  %v649_v54 = vunpack.i.h.bf16 %v647_v31  ;;  %v648_v55 = vunpack.i.l.bf16 %v647_v31 }
  0x86   : > { %v390_v40 = vsel %vm389_vm5, %v638_v36, %v639_v35  ;;  %v391_v41 = vsel %vm389_vm5, %v639_v35, %v638_v36  ;;  %vm265_vm5 = vcmp.gt.f32.partialorder %v264_v48, 0.0  ;;  %v373_v9 = vsel %vm372_vm10, %v648_v55, %v649_v54 }
  0x87   : > { %v400_v46 = vsel %vm780_vm6, %v390_v40, 0.0  ;;  %v401_v47 = vsel %vm784_vm8, %v391_v41, 0.0  ;;  %vm282_vm6 = vcmp.gt.f32.partialorder %v573_v49, 0.0  ;;  %vm585_vm8 = vmpackc.low %vm802_vm12, %vm788_vm9  ;;  %v374_v10 = vsel %vm372_vm10, %v649_v54, %v648_v55  ;;  %v617_v49 = vld [vmem:[%s990_s2] sm:$0xff]  ;;  %v416_v54 = vld [vmem:[%s991_s3 + $0x10] sm:$0xff] }
  0x88   : > { %v410_v50 = vpack.c.bf16 %v400_v46, %v400_v46  ;;  %v411_v51 = vpack.c.bf16 %v401_v47, %v401_v47  ;;  %v266_v11 = vsel %vm265_vm5, 1, %v693_v3  ;;  %v283_v12 = vsel %vm282_vm6, 1, %v693_v3  ;;  %vm1012_vm10 = vmmov %vm1011_vm3  ;;  %v417_v55 = vld [vmem:[%s991_s3 + $0x18] sm:$0xff] }
  0x89   : > { %vm872_vm5 = vcmp.eq.s32.totalorder %v329_v37, 1  ;;  %vm876_vm6 = vcmp.eq.s32.totalorder %v346_v38, 1  ;;  %v267_v28 = vperm.slane %v266_v11, 0  ;;  %v284_v29 = vperm.slane %v283_v12, 0 }
  0x8a   : > { %v429_v58 = vsel %vm427_vm7, %v410_v50, 0  ;;  %v432_v59 = vsel %vm427_vm7, %v411_v51, 0  ;;  %vm601_vm13 = vmpackc.low %vm876_vm6, %vm872_vm5  ;;  %vm907_vm9 = vcmp.eq.s32.totalorder %v318_v63, 1  ;;  %vm911_vm12 = vcmp.eq.s32.totalorder %v302_v2, 1  ;;  %v462_v2 = vld [vmem:[%s992_s4] sm:$0x3] }
  0x8b   : > { %v642_v60 = vpop.permute.xlu0 %641  ;;  %437 = vmatpush.bf16.msra.mxu0 %v429_v58  ;;  %451 = vmatpush.bf16.msra.mxu1 %v432_v59  ;;  %v652_v61 = vpop.permute.xlu1 %651  ;;  %v268_v33 = vperm.slane %v266_v11, 1  ;;  %v285_v34 = vperm.slane %v283_v12, 1  ;;  %v605_v46 = vpack.c.bf16 %v312_v24, %v295_v23 }
  0x8c   : > { %v644_v5 = vunpack.i.h.bf16 %v642_v60  ;;  %v643_v6 = vunpack.i.l.bf16 %v642_v60  ;;  %v654_v7 = vunpack.i.h.bf16 %v652_v61  ;;  %v653_v8 = vunpack.i.l.bf16 %v652_v61 }
  0x8d   : > { %vm287_vm5 = vcmp.eq.s32.totalorder %v285_v34, 1 }
  0x8e   : > { %v356_v13 = vsel %vm355_vm11, %v643_v6, %v644_v5  ;;  %v357_v15 = vsel %vm355_vm11, %v644_v5, %v643_v6  ;;  %v339_v16 = vsel %vm1011_vm3, %v653_v8, %v654_v7  ;;  %v340_v17 = vsel %vm1012_vm10, %v654_v7, %v653_v8  ;;  %vm588_vm11 = vmpackc.low %vm827_vm15, %vm823_vm4 }
  0x8f   : > { %v586_v18 = vpack.c.bf16 %v373_v9, %v356_v13  ;;  %v599_v19 = vpack.c.bf16 %v374_v10, %v357_v15  ;;  %v589_v26 = vpack.c.bf16 %v339_v16, %v743_v0  ;;  %v602_v27 = vpack.c.bf16 %v340_v17, %v745_v1  ;;  %vm604_vm15 = vmpackc.low %vm915_vm0, %vm911_vm12 }
  0x90   : > { %vm935_vm3 = vcmp.eq.s32.totalorder %v267_v28, 1  ;;  %vm939_vm10 = vcmp.eq.s32.totalorder %v284_v29, 1  ;;  %vm270_vm4 = vcmp.eq.s32.totalorder %v268_v33, 1 }
  0x91   : > { %587 = vmatpush.bf16.msk.msra.mxu0 %vm585_vm8, %v586_v18  ;;  %600 = vmatpush.bf16.msk.msra.mxu1 %vm598_vm1, %v599_v19  ;;  %vm277_vm8 = vcmp.lt.s32.totalorder %v771_v14, 16  ;;  %vm591_vm1 = vmpackc.low %vm907_vm9, %vm903_vm14  ;;  %v465_v14 = vld [vmem:[%s993_s5] sm:$0xf]  ;;  %vm471_vm14 = vcmask 130048  }
  0x92   : > { %vm594_vm6 = vmpackc.low %vm939_vm10, %vm935_vm3  ;;  %468 = vperm.xlu2 %675, %v465_v14  }
  0x93   : > { %v672_v1 = vpop.permute.xlu1 %671  ;;  %v667_v32 = vpop.permute.xlu0 %666 }
  0x94   : > { %v674_v35 = vunpack.i.h.bf16 %v672_v1  ;;  %v673_v36 = vunpack.i.l.bf16 %v672_v1  ;;  %v669_v37 = vunpack.i.h.bf16 %v667_v32  ;;  %v668_v38 = vunpack.i.l.bf16 %v667_v32 }
  0x95   : > { %590 = vmatpush.bf16.msk.msra.mxu0 %vm588_vm11, %v589_v26  ;;  %603 = vmatpush.bf16.msk.msra.mxu1 %vm601_vm13, %v602_v27  ;;  %vm607_vm11 = vmpackc.low %vm287_vm5, %vm270_vm4  ;;  %vm423_vm13 = vcmask 588800  }
  0x96   : > { %v263_v41 = vsel %vm261_vm2, %v669_v37, %v668_v38  ;;  %v279_v42 = vsel %vm277_vm8, %v674_v35, %v673_v36  ;;  %v262_v43 = vsel %vm261_vm2, %v668_v38, %v669_v37  ;;  %v278_v44 = vsel %vm277_vm8, %v673_v36, %v674_v35 }
  0x97   : > { %v595_v47 = vpack.c.bf16 %v279_v42, %v263_v41  ;;  %v608_v48 = vpack.c.bf16 %v278_v44, %v262_v43 }
  0x99   : > { %593 = vmatpush.bf16.msk.msra.mxu0 %vm591_vm1, %v592_v45  ;;  %606 = vmatpush.bf16.msk.msra.mxu1 %vm604_vm15, %v605_v46 }
  0x9d   : > { %596 = vmatpush.bf16.msk.msra.mxu0 %vm594_vm6, %v595_v47  ;;  %609 = vmatpush.bf16.msk.msra.mxu1 %vm607_vm11, %v608_v48 }
  0xa0   : > { %597 = vmatmul.msk.bf16.vlgmr.msra.gmra.mxu0 %vm423_vm13, %v617_v49  ;;  %610 = vmatmul.msk.bf16.vlgmr.msra.gmra.mxu1 %vm423_vm13, %v617_v49 }
  0xec   : > { %v469_v4 = vpop.permute.xlu2 %468 }
 0x11d   : > { %v443_v50 = vpop.f32.mrf.mxu0  ;;  %v457_v51 = vpop.f32.mrf.mxu1 }
 0x11e   : > { %v444_v58 = vadd.f32 %v443_v50, %v414_v52  ;;  %v458_v59 = vadd.f32 %v457_v51, %v415_v53 }
 0x125   : > { %v445_v56 = vpop.f32.mrf.mxu0  ;;  %v459_v57 = vpop.f32.mrf.mxu1 }
 0x126   : > { %v446_v60 = vadd.f32 %v445_v56, %v416_v54  ;;  %v460_v61 = vadd.f32 %v459_v57, %v417_v55 }
 0x128   : > { %v463_v62 = vpack.c.bf16 %v446_v60, %v444_v58  ;;  %v464_v63 = vpack.c.bf16 %v460_v61, %v458_v59 }
 0x12a   : > { %482 = vmatpush.bf16.msra.mxu2 %v463_v62  ;;  %495 = vmatpush.bf16.msra.mxu3 %v464_v63 }
 0x12d   : > { %611 = vmatmul.msk.bf16.vlgmr.msra.gmra.mxu2 %vm471_vm14, %v462_v2  ;;  %612 = vmatmul.msk.bf16.vlgmr.msra.gmra.mxu3 %vm471_vm14, %v462_v2 }
 0x1b0   : > { %v484_v5 = vpop.f32.mrf.mxu2  ;;  %v497_v6 = vpop.f32.mrf.mxu3 }
 0x1b1   : > { %v485_v7 = vadd.f32 %v484_v5, %v469_v4  ;;  %v498_v8 = vadd.f32 %v497_v6, %v469_v4 }
 0x1b3   : > { %v502_v9 = vmax.f32 %v498_v8, 0.0  ;;  %v501_v10 = vmax.f32 %v485_v7, 0.0 }
 0x1b5   : > { %v505_v11 = vrot.slane %v502_v9, 4 }
 0x1b7   : > { %v506_v12 = vsel %vm427_vm7, %v501_v10, %v505_v11 }
 0x1b8   : > { %508 = vst [vmem:[%s251_s26] sm:$0xff] %v506_v12  ;;  %v486_v13 = vpop.f32.mrf.mxu2  ;;  %v499_v15 = vpop.f32.mrf.mxu3 }
 0x1b9 PF: > { %s16_s21 = sadd.s32 1, %s683_s21  }
 0x1ba   : > { %p13_p4 = scmp.ge.s32.totalorder %s16_s21, 4  }
 0x1bc   :  { %15 = sbr.rel (!%p13_p4) target bundleno = 1 (0x1), region = 82 }

</bundles_post_ra>
